<compile_context>
chip_gen: v7x
topology: tpu7x:2x2x1
jax: 0.10.0
libtpu: 0.0.40
codegen_flags: <defaults>
</compile_context>

<pallas_src>
import jax
import jax.numpy as jnp
from jax import lax
from jax.experimental import pallas as pl
from jax.experimental.pallas import tpu as pltpu

LN_EPS = 1e-5


def transformer_block_kernel(x_ref, wq_ref, wk_ref, wv_ref,
                             bq_ref, bk_ref, bv_ref, wo_ref, bo_ref,
                             g1_ref, b1ln_ref, w1_ref, b1_ref, w2_ref, b2_ref,
                             g2_ref, b2ln_ref, o_ref, acc_ref):
    """Grid = (batch, head).  Each step computes one head's attention and folds
    it through that head's slice of the output projection into an f32 VMEM
    accumulator; residual + LN1 + FFN + LN2 run once, on the last head step."""
    h = pl.program_id(1)
    last = pl.num_programs(1) - 1

    x = x_ref[0]                                    # (S, E) f32
    x16 = x.astype(jnp.bfloat16)

    # Per-head projections (scale already folded into wq / bq on the host).
    q = jnp.dot(x16, wq_ref[0], preferred_element_type=jnp.float32) + bq_ref[0]
    k = jnp.dot(x16, wk_ref[0], preferred_element_type=jnp.float32) + bk_ref[0]
    v = jnp.dot(x16, wv_ref[0], preferred_element_type=jnp.float32) + bv_ref[0]

    # scores = q @ k^T  (contract last dims; no explicit transpose)
    s = lax.dot_general(q.astype(jnp.bfloat16), k.astype(jnp.bfloat16),
                        (((1,), (1,)), ((), ())),
                        preferred_element_type=jnp.float32)          # (S, S)
    s = s - jnp.max(s, axis=-1, keepdims=True)
    p = jnp.exp(s)
    p = p * pl.reciprocal(jnp.sum(p, axis=-1, keepdims=True), approx=True)

    o_h = jnp.dot(p.astype(jnp.bfloat16), v.astype(jnp.bfloat16),
                  preferred_element_type=jnp.float32)                # (S, dh)

    # This head's contribution through the output projection: (S, dh)@(dh, E).
    part = jnp.dot(o_h.astype(jnp.bfloat16), wo_ref[0],
                   preferred_element_type=jnp.float32)               # (S, E)

    @pl.when(h == 0)
    def _():
        acc_ref[...] = jnp.zeros_like(acc_ref)

    acc_ref[...] += part

    @pl.when(h == last)
    def _():
        attn = acc_ref[...] + bo_ref[...]                            # (S, E)

        # residual + LayerNorm 1 (dropout == identity in eval mode)
        h1 = x + attn
        mu1 = jnp.mean(h1, axis=-1, keepdims=True)
        var1 = jnp.mean((h1 - mu1) ** 2, axis=-1, keepdims=True)
        h1 = (h1 - mu1) * lax.rsqrt(var1 + LN_EPS) * g1_ref[...] + b1ln_ref[...]

        # FFN: Linear -> ReLU -> Linear (weights stored (in, out))
        f = jnp.dot(h1.astype(jnp.bfloat16), w1_ref[...],
                    preferred_element_type=jnp.float32) + b1_ref[...]    # (S, F)
        f = jnp.maximum(f, 0.0)
        f = jnp.dot(f.astype(jnp.bfloat16), w2_ref[...],
                    preferred_element_type=jnp.float32) + b2_ref[...]    # (S, E)

        # residual + LayerNorm 2
        h2 = h1 + f
        mu2 = jnp.mean(h2, axis=-1, keepdims=True)
        var2 = jnp.mean((h2 - mu2) ** 2, axis=-1, keepdims=True)
        out = (h2 - mu2) * lax.rsqrt(var2 + LN_EPS) * g2_ref[...] + b2ln_ref[...]

        o_ref[0] = out.astype(o_ref.dtype)


def prepare_params(params, heads):
    """Host-side (free) layout plumbing: split packed QKV per head, pre-transpose
    all Linear weights to (in, out), fold 1/sqrt(dh) into the Q path, cast MXU
    weights to bf16 (biases / LN params stay f32)."""
    E = params["wo"].shape[0]
    F = params["w1"].shape[0]
    dh = E // heads
    scale = 1.0 / (dh ** 0.5)

    wqkv = params["wqkv"]                      # (3E, E) torch (out, in)
    bqkv = params["bqkv"].reshape(3 * E)
    wq, wk, wv = wqkv[:E], wqkv[E:2 * E], wqkv[2 * E:]
    bq, bk, bv = bqkv[:E], bqkv[E:2 * E], bqkv[2 * E:]

    def split_heads_w(w):                      # (E_out, E_in) -> (H, E_in, dh)
        return jnp.transpose(w.T.reshape(E, heads, dh), (1, 0, 2))

    def split_heads_b(b):                      # (E,) -> (H, 1, dh)
        return b.reshape(heads, 1, dh)

    return {
        "wq": (split_heads_w(wq) * scale).astype(jnp.bfloat16),
        "wk": split_heads_w(wk).astype(jnp.bfloat16),
        "wv": split_heads_w(wv).astype(jnp.bfloat16),
        "bq": (split_heads_b(bq) * scale).astype(jnp.float32),
        "bk": split_heads_b(bk).astype(jnp.float32),
        "bv": split_heads_b(bv).astype(jnp.float32),
        "wo": params["wo"].T.reshape(heads, dh, E).astype(jnp.bfloat16),
        "bo": params["bo"].reshape(1, E).astype(jnp.float32),
        "g1": params["g1"].reshape(1, E).astype(jnp.float32),
        "b1ln": params["b1ln"].reshape(1, E).astype(jnp.float32),
        "w1": params["w1"].T.astype(jnp.bfloat16),          # (E, F)
        "b1": params["b1"].reshape(1, F).astype(jnp.float32),
        "w2": params["w2"].T.astype(jnp.bfloat16),          # (F, E)
        "b2": params["b2"].reshape(1, E).astype(jnp.float32),
        "g2": params["g2"].reshape(1, E).astype(jnp.float32),
        "b2ln": params["b2ln"].reshape(1, E).astype(jnp.float32),
    }


def transformer_block(x, params, heads):
    """x: (B, S, E) float32 -> (B, S, E) float32. attn_mask=None path only."""
    B, S, E = x.shape
    dh = E // heads
    kp = prepare_params(params, heads)
    F = kp["w1"].shape[1]

    def batch_map(b, h):
        return (b, 0, 0)

    def head_map(b, h):
        return (h, 0, 0)

    def const2(b, h):
        return (0, 0)

    in_specs = [
        pl.BlockSpec((1, S, E), batch_map),      # x
        pl.BlockSpec((1, E, dh), head_map),      # wq (per head)
        pl.BlockSpec((1, E, dh), head_map),      # wk
        pl.BlockSpec((1, E, dh), head_map),      # wv
        pl.BlockSpec((1, 1, dh), head_map),      # bq
        pl.BlockSpec((1, 1, dh), head_map),      # bk
        pl.BlockSpec((1, 1, dh), head_map),      # bv
        pl.BlockSpec((1, dh, E), head_map),      # wo (per head)
        pl.BlockSpec((1, E), const2),            # bo
        pl.BlockSpec((1, E), const2),            # g1
        pl.BlockSpec((1, E), const2),            # b1ln
        pl.BlockSpec((E, F), const2),            # w1
        pl.BlockSpec((1, F), const2),            # b1
        pl.BlockSpec((F, E), const2),            # w2
        pl.BlockSpec((1, E), const2),            # b2
        pl.BlockSpec((1, E), const2),            # g2
        pl.BlockSpec((1, E), const2),            # b2ln
    ]

    flops = (2 * B * S * E * (3 * E)             # QKV projections
             + 2 * B * heads * S * S * dh * 2    # QK^T and PV
             + 2 * B * S * E * E                 # output projection
             + 2 * B * S * E * F * 2)            # FFN
    transcendentals = B * heads * S * S + 4 * B * S
    bytes_accessed = (2 * B * S * E * 4
                      + (3 * E * E + E * E + E * F + F * E) * 2
                      + (3 * E + E + F + E + 4 * E) * 4)

    return pl.pallas_call(
        transformer_block_kernel,
        out_shape=jax.ShapeDtypeStruct((B, S, E), x.dtype),
        grid=(B, heads),
        in_specs=in_specs,
        out_specs=pl.BlockSpec((1, S, E), batch_map),
        scratch_shapes=[pltpu.VMEM((S, E), jnp.float32)],
        compiler_params=pltpu.CompilerParams(
            dimension_semantics=("parallel", "arbitrary"),
            vmem_limit_bytes=32 * 1024 * 1024),
        cost_estimate=pl.CostEstimate(flops=flops,
                                      transcendentals=transcendentals,
                                      bytes_accessed=bytes_accessed),
    )(x, kp["wq"], kp["wk"], kp["wv"], kp["bq"], kp["bk"], kp["bv"],
      kp["wo"], kp["bo"], kp["g1"], kp["b1ln"], kp["w1"], kp["b1"],
      kp["w2"], kp["b2"], kp["g2"], kp["b2ln"])


def init_params(key, embed_dim, ff_hidden_dim):
    """Deterministic synthetic parameters in the PyTorch module's layout."""
    ks = jax.random.split(key, 8)

    def u(k, shape, fan_in):
        bound = 1.0 / (fan_in ** 0.5)
        return jax.random.uniform(k, shape, jnp.float32, -bound, bound)

    E, F = embed_dim, ff_hidden_dim
    return {
        # nn.MultiheadAttention: packed in_proj (3E, E) + bias, out_proj (E, E) + bias
        "wqkv": u(ks[0], (3 * E, E), E),
        "bqkv": u(ks[1], (1, 3 * E), E),
        "wo":   u(ks[2], (E, E), E),
        "bo":   u(ks[3], (1, E), E),
        # LayerNorm 1
        "g1":   jnp.ones((1, E), jnp.float32),
        "b1ln": jnp.zeros((1, E), jnp.float32),
        # FF: Linear(E, F), Linear(F, E)   (torch (out, in) layout)
        "w1":   u(ks[4], (F, E), E),
        "b1":   u(ks[5], (1, F), E),
        "w2":   u(ks[6], (E, F), F),
        "b2":   u(ks[7], (1, E), F),
        # LayerNorm 2
        "g2":   jnp.ones((1, E), jnp.float32),
        "b2ln": jnp.zeros((1, E), jnp.float32),
    }


if __name__ == "__main__":
    # Small shapes consistent with the module: batch=2, seq=8, embed=32,
    # heads=4, ff_hidden=64, dropout=0.1 (inactive at inference).
    B, S, E, HEADS, FF = 2, 8, 32, 4, 64

    root = jax.random.PRNGKey(0)
    k_x, k_p = jax.random.split(root)
    x = jax.random.normal(k_x, (B, S, E), jnp.float32)
    params = init_params(k_p, E, FF)

    y = transformer_block(x, params, HEADS)
    jax.block_until_ready(y)
    assert y.shape == (B, S, E)
    print("KERNEL_OK")
</pallas_src>

<mosaic_0001>
module attributes {stable_mosaic.version = 11 : i64} {
  func.func @transformer_block_kernel(%arg0: i32, %arg1: i32, %arg2: memref<1x8x32xf32, #tpu.memory_space<vmem>>, %arg3: memref<1x32x8xbf16, #tpu.memory_space<vmem>>, %arg4: memref<1x32x8xbf16, #tpu.memory_space<vmem>>, %arg5: memref<1x32x8xbf16, #tpu.memory_space<vmem>>, %arg6: memref<1x1x8xf32, #tpu.memory_space<vmem>>, %arg7: memref<1x1x8xf32, #tpu.memory_space<vmem>>, %arg8: memref<1x1x8xf32, #tpu.memory_space<vmem>>, %arg9: memref<1x8x32xbf16, #tpu.memory_space<vmem>>, %arg10: memref<1x32xf32, #tpu.memory_space<vmem>>, %arg11: memref<1x32xf32, #tpu.memory_space<vmem>>, %arg12: memref<1x32xf32, #tpu.memory_space<vmem>>, %arg13: memref<32x64xbf16, #tpu.memory_space<vmem>>, %arg14: memref<1x64xf32, #tpu.memory_space<vmem>>, %arg15: memref<64x32xbf16, #tpu.memory_space<vmem>>, %arg16: memref<1x32xf32, #tpu.memory_space<vmem>>, %arg17: memref<1x32xf32, #tpu.memory_space<vmem>>, %arg18: memref<1x32xf32, #tpu.memory_space<vmem>>, %arg19: memref<1x8x32xf32, #tpu.memory_space<vmem>>, %arg20: memref<8x32xf32, #tpu.memory_space<vmem>>) attributes {dimension_semantics = [#tpu.dimension_semantics<parallel>, #tpu.dimension_semantics<arbitrary>], iteration_bounds = array<i64: 2, 4>, scalar_prefetch = 0 : i64, scratch_operands = 1 : i64, tpu.core_type = #tpu.core_type<tc>, window_params = [{transform_indices = @transform_0, window_bounds = array<i64: 1, 8, 32>}, {transform_indices = @transform_1, window_bounds = array<i64: 1, 32, 8>}, {transform_indices = @transform_2, window_bounds = array<i64: 1, 32, 8>}, {transform_indices = @transform_3, window_bounds = array<i64: 1, 32, 8>}, {transform_indices = @transform_4, window_bounds = array<i64: 1, 1, 8>}, {transform_indices = @transform_5, window_bounds = array<i64: 1, 1, 8>}, {transform_indices = @transform_6, window_bounds = array<i64: 1, 1, 8>}, {transform_indices = @transform_7, window_bounds = array<i64: 1, 8, 32>}, {pipeline_mode = #tpu.pipeline_mode<synchronous>, transform_indices = @transform_8, window_bounds = array<i64: 1, 32>}, {pipeline_mode = #tpu.pipeline_mode<synchronous>, transform_indices = @transform_9, window_bounds = array<i64: 1, 32>}, {pipeline_mode = #tpu.pipeline_mode<synchronous>, transform_indices = @transform_10, window_bounds = array<i64: 1, 32>}, {pipeline_mode = #tpu.pipeline_mode<synchronous>, transform_indices = @transform_11, window_bounds = array<i64: 32, 64>}, {pipeline_mode = #tpu.pipeline_mode<synchronous>, transform_indices = @transform_12, window_bounds = array<i64: 1, 64>}, {pipeline_mode = #tpu.pipeline_mode<synchronous>, transform_indices = @transform_13, window_bounds = array<i64: 64, 32>}, {pipeline_mode = #tpu.pipeline_mode<synchronous>, transform_indices = @transform_14, window_bounds = array<i64: 1, 32>}, {pipeline_mode = #tpu.pipeline_mode<synchronous>, transform_indices = @transform_15, window_bounds = array<i64: 1, 32>}, {pipeline_mode = #tpu.pipeline_mode<synchronous>, transform_indices = @transform_16, window_bounds = array<i64: 1, 32>}, {transform_indices = @transform_17, window_bounds = array<i64: 1, 8, 32>}]} {
    %c0 = arith.constant 0 : index
    %c0_0 = arith.constant 0 : index
    %c0_1 = arith.constant 0 : index
    %0 = vector.load %arg2[%c0, %c0_0, %c0_1] : memref<1x8x32xf32, #tpu.memory_space<vmem>>, vector<1x8x32xf32>
    %1 = vector.shape_cast %0 : vector<1x8x32xf32> to vector<8x32xf32>
    %2 = arith.truncf %1 : vector<8x32xf32> to vector<8x32xbf16>
    %c0_2 = arith.constant 0 : index
    %c0_3 = arith.constant 0 : index
    %c0_4 = arith.constant 0 : index
    %3 = vector.load %arg3[%c0_2, %c0_3, %c0_4] : memref<1x32x8xbf16, #tpu.memory_space<vmem>>, vector<1x32x8xbf16>
    %4 = vector.shape_cast %3 : vector<1x32x8xbf16> to vector<32x8xbf16>
    %cst = arith.constant dense<0.000000e+00> : vector<8x8xf32>
    %5 = tpu.matmul %2, %4, %cst {dimension_numbers = #tpu.dot_dimension_numbers<[1], [0], [0], [1], [0, 0, 1, 1], [], []>} : vector<8x32xbf16>, vector<32x8xbf16>, vector<8x8xf32> -> vector<8x8xf32>
    %c0_5 = arith.constant 0 : index
    %c0_6 = arith.constant 0 : index
    %c0_7 = arith.constant 0 : index
    %6 = vector.load %arg6[%c0_5, %c0_6, %c0_7] : memref<1x1x8xf32, #tpu.memory_space<vmem>>, vector<1x1x8xf32>
    %7 = vector.shape_cast %6 : vector<1x1x8xf32> to vector<1x8xf32>
    %8 = vector.broadcast %7 : vector<1x8xf32> to vector<8x8xf32>
    %9 = arith.addf %5, %8 : vector<8x8xf32>
    %c0_8 = arith.constant 0 : index
    %c0_9 = arith.constant 0 : index
    %c0_10 = arith.constant 0 : index
    %10 = vector.load %arg4[%c0_8, %c0_9, %c0_10] : memref<1x32x8xbf16, #tpu.memory_space<vmem>>, vector<1x32x8xbf16>
    %11 = vector.shape_cast %10 : vector<1x32x8xbf16> to vector<32x8xbf16>
    %cst_11 = arith.constant dense<0.000000e+00> : vector<8x8xf32>
    %12 = tpu.matmul %2, %11, %cst_11 {dimension_numbers = #tpu.dot_dimension_numbers<[1], [0], [0], [1], [0, 0, 1, 1], [], []>} : vector<8x32xbf16>, vector<32x8xbf16>, vector<8x8xf32> -> vector<8x8xf32>
    %c0_12 = arith.constant 0 : index
    %c0_13 = arith.constant 0 : index
    %c0_14 = arith.constant 0 : index
    %13 = vector.load %arg7[%c0_12, %c0_13, %c0_14] : memref<1x1x8xf32, #tpu.memory_space<vmem>>, vector<1x1x8xf32>
    %14 = vector.shape_cast %13 : vector<1x1x8xf32> to vector<1x8xf32>
    %15 = vector.broadcast %14 : vector<1x8xf32> to vector<8x8xf32>
    %16 = arith.addf %12, %15 : vector<8x8xf32>
    %c0_15 = arith.constant 0 : index
    %c0_16 = arith.constant 0 : index
    %c0_17 = arith.constant 0 : index
    %17 = vector.load %arg5[%c0_15, %c0_16, %c0_17] : memref<1x32x8xbf16, #tpu.memory_space<vmem>>, vector<1x32x8xbf16>
    %18 = vector.shape_cast %17 : vector<1x32x8xbf16> to vector<32x8xbf16>
    %cst_18 = arith.constant dense<0.000000e+00> : vector<8x8xf32>
    %19 = tpu.matmul %2, %18, %cst_18 {dimension_numbers = #tpu.dot_dimension_numbers<[1], [0], [0], [1], [0, 0, 1, 1], [], []>} : vector<8x32xbf16>, vector<32x8xbf16>, vector<8x8xf32> -> vector<8x8xf32>
    %c0_19 = arith.constant 0 : index
    %c0_20 = arith.constant 0 : index
    %c0_21 = arith.constant 0 : index
    %20 = vector.load %arg8[%c0_19, %c0_20, %c0_21] : memref<1x1x8xf32, #tpu.memory_space<vmem>>, vector<1x1x8xf32>
    %21 = vector.shape_cast %20 : vector<1x1x8xf32> to vector<1x8xf32>
    %22 = vector.broadcast %21 : vector<1x8xf32> to vector<8x8xf32>
    %23 = arith.addf %19, %22 : vector<8x8xf32>
    %24 = arith.truncf %9 : vector<8x8xf32> to vector<8x8xbf16>
    %25 = arith.truncf %16 : vector<8x8xf32> to vector<8x8xbf16>
    %cst_22 = arith.constant dense<0.000000e+00> : vector<8x8xf32>
    %26 = tpu.matmul %24, %25, %cst_22 {dimension_numbers = #tpu.dot_dimension_numbers<[1], [1], [0], [0], [0, 0, 1, 0], [], []>} : vector<8x8xbf16>, vector<8x8xbf16>, vector<8x8xf32> -> vector<8x8xf32>
    %cst_23 = arith.constant dense<0xFF800000> : vector<8xf32>
    %27 = vector.multi_reduction <maximumf>, %26, %cst_23 [1] : vector<8x8xf32> to vector<8xf32>
    %28 = vector.shape_cast %27 : vector<8xf32> to vector<8x1xf32>
    %29 = vector.broadcast %28 : vector<8x1xf32> to vector<8x8xf32>
    %30 = arith.subf %26, %29 : vector<8x8xf32>
    %31 = math.exp %30 : vector<8x8xf32>
    %cst_24 = arith.constant dense<0.000000e+00> : vector<8xf32>
    %32 = vector.multi_reduction <add>, %31, %cst_24 [1] : vector<8x8xf32> to vector<8xf32>
    %33 = vector.shape_cast %32 : vector<8xf32> to vector<8x1xf32>
    %34 = tpu.reciprocal %33 {approx = true} : vector<8x1xf32> -> vector<8x1xf32>
    %35 = vector.broadcast %34 : vector<8x1xf32> to vector<8x8xf32>
    %36 = arith.mulf %31, %35 : vector<8x8xf32>
    %37 = arith.truncf %36 : vector<8x8xf32> to vector<8x8xbf16>
    %38 = arith.truncf %23 : vector<8x8xf32> to vector<8x8xbf16>
    %cst_25 = arith.constant dense<0.000000e+00> : vector<8x8xf32>
    %39 = tpu.matmul %37, %38, %cst_25 {dimension_numbers = #tpu.dot_dimension_numbers<[1], [0], [0], [1], [0, 0, 1, 1], [], []>} : vector<8x8xbf16>, vector<8x8xbf16>, vector<8x8xf32> -> vector<8x8xf32>
    %40 = arith.truncf %39 : vector<8x8xf32> to vector<8x8xbf16>
    %c0_26 = arith.constant 0 : index
    %c0_27 = arith.constant 0 : index
    %c0_28 = arith.constant 0 : index
    %41 = vector.load %arg9[%c0_26, %c0_27, %c0_28] : memref<1x8x32xbf16, #tpu.memory_space<vmem>>, vector<1x8x32xbf16>
    %42 = vector.shape_cast %41 : vector<1x8x32xbf16> to vector<8x32xbf16>
    %cst_29 = arith.constant dense<0.000000e+00> : vector<8x32xf32>
    %43 = tpu.matmul %40, %42, %cst_29 {dimension_numbers = #tpu.dot_dimension_numbers<[1], [0], [0], [1], [0, 0, 1, 1], [], []>} : vector<8x8xbf16>, vector<8x32xbf16>, vector<8x32xf32> -> vector<8x32xf32>
    %c0_i32 = arith.constant 0 : i32
    %44 = arith.cmpi eq, %arg1, %c0_i32 : i32
    %45 = arith.extui %44 : i1 to i32
    %c0_i32_30 = arith.constant 0 : i32
    %46 = arith.cmpi ne, %45, %c0_i32_30 : i32
    scf.if %46 {
      %cst_36 = arith.constant 0.000000e+00 : f32
      %53 = vector.broadcast %cst_36 : f32 to vector<8x32xf32>
      %c0_37 = arith.constant 0 : index
      %c0_38 = arith.constant 0 : index
      %54 = vector.load %arg20[%c0_37, %c0_38] : memref<8x32xf32, #tpu.memory_space<vmem>>, vector<8x32xf32>
      tpu.vector_store %arg20[%c0_37, %c0_38], %53 {strides = array<i32>} : memref<8x32xf32, #tpu.memory_space<vmem>>, vector<8x32xf32>,
    } else {
    }
    %c0_31 = arith.constant 0 : index
    %c0_32 = arith.constant 0 : index
    %47 = vector.load %arg20[%c0_31, %c0_32] : memref<8x32xf32, #tpu.memory_space<vmem>>, vector<8x32xf32>
    %48 = arith.addf %47, %43 : vector<8x32xf32>
    %c0_33 = arith.constant 0 : index
    %c0_34 = arith.constant 0 : index
    %49 = vector.load %arg20[%c0_33, %c0_34] : memref<8x32xf32, #tpu.memory_space<vmem>>, vector<8x32xf32>
    tpu.vector_store %arg20[%c0_33, %c0_34], %48 {strides = array<i32>} : memref<8x32xf32, #tpu.memory_space<vmem>>, vector<8x32xf32>,
    %c3_i32 = arith.constant 3 : i32
    %50 = arith.cmpi eq, %arg1, %c3_i32 : i32
    %51 = arith.extui %50 : i1 to i32
    %c0_i32_35 = arith.constant 0 : i32
    %52 = arith.cmpi ne, %51, %c0_i32_35 : i32
    scf.if %52 {
      %c0_36 = arith.constant 0 : index
      %c0_37 = arith.constant 0 : index
      %53 = vector.load %arg20[%c0_36, %c0_37] : memref<8x32xf32, #tpu.memory_space<vmem>>, vector<8x32xf32>
      %c0_38 = arith.constant 0 : index
      %c0_39 = arith.constant 0 : index
      %54 = vector.load %arg10[%c0_38, %c0_39] : memref<1x32xf32, #tpu.memory_space<vmem>>, vector<1x32xf32>
      %55 = vector.broadcast %54 : vector<1x32xf32> to vector<8x32xf32>
      %56 = arith.addf %53, %55 : vector<8x32xf32>
      %57 = arith.addf %1, %56 : vector<8x32xf32>
      %cst_40 = arith.constant dense<0.000000e+00> : vector<8xf32>
      %58 = vector.multi_reduction <add>, %57, %cst_40 [1] : vector<8x32xf32> to vector<8xf32>
      %59 = vector.shape_cast %58 : vector<8xf32> to vector<8x1xf32>
      %cst_41 = arith.constant 3.200000e+01 : f32
      %60 = vector.broadcast %cst_41 : f32 to vector<8x1xf32>
      %61 = arith.divf %59, %60 : vector<8x1xf32>
      %62 = vector.broadcast %61 : vector<8x1xf32> to vector<8x32xf32>
      %63 = arith.subf %57, %62 : vector<8x32xf32>
      %64 = arith.mulf %63, %63 : vector<8x32xf32>
      %cst_42 = arith.constant dense<0.000000e+00> : vector<8xf32>
      %65 = vector.multi_reduction <add>, %64, %cst_42 [1] : vector<8x32xf32> to vector<8xf32>
      %66 = vector.shape_cast %65 : vector<8xf32> to vector<8x1xf32>
      %cst_43 = arith.constant 3.200000e+01 : f32
      %67 = vector.broadcast %cst_43 : f32 to vector<8x1xf32>
      %68 = arith.divf %66, %67 : vector<8x1xf32>
      %69 = vector.broadcast %61 : vector<8x1xf32> to vector<8x32xf32>
      %70 = arith.subf %57, %69 : vector<8x32xf32>
      %cst_44 = arith.constant 9.99999974E-6 : f32
      %71 = vector.broadcast %cst_44 : f32 to vector<8x1xf32>
      %72 = arith.addf %68, %71 : vector<8x1xf32>
      %73 = math.rsqrt %72 : vector<8x1xf32>
      %74 = vector.broadcast %73 : vector<8x1xf32> to vector<8x32xf32>
      %75 = arith.mulf %70, %74 : vector<8x32xf32>
      %c0_45 = arith.constant 0 : index
      %c0_46 = arith.constant 0 : index
      %76 = vector.load %arg11[%c0_45, %c0_46] : memref<1x32xf32, #tpu.memory_space<vmem>>, vector<1x32xf32>
      %77 = vector.broadcast %76 : vector<1x32xf32> to vector<8x32xf32>
      %78 = arith.mulf %75, %77 : vector<8x32xf32>
      %c0_47 = arith.constant 0 : index
      %c0_48 = arith.constant 0 : index
      %79 = vector.load %arg12[%c0_47, %c0_48] : memref<1x32xf32, #tpu.memory_space<vmem>>, vector<1x32xf32>
      %80 = vector.broadcast %79 : vector<1x32xf32> to vector<8x32xf32>
      %81 = arith.addf %78, %80 : vector<8x32xf32>
      %82 = arith.truncf %81 : vector<8x32xf32> to vector<8x32xbf16>
      %c0_49 = arith.constant 0 : index
      %c0_50 = arith.constant 0 : index
      %83 = vector.load %arg13[%c0_49, %c0_50] : memref<32x64xbf16, #tpu.memory_space<vmem>>, vector<32x64xbf16>
      %cst_51 = arith.constant dense<0.000000e+00> : vector<8x64xf32>
      %84 = tpu.matmul %82, %83, %cst_51 {dimension_numbers = #tpu.dot_dimension_numbers<[1], [0], [0], [1], [0, 0, 1, 1], [], []>} : vector<8x32xbf16>, vector<32x64xbf16>, vector<8x64xf32> -> vector<8x64xf32>
      %c0_52 = arith.constant 0 : index
      %c0_53 = arith.constant 0 : index
      %85 = vector.load %arg14[%c0_52, %c0_53] : memref<1x64xf32, #tpu.memory_space<vmem>>, vector<1x64xf32>
      %86 = vector.broadcast %85 : vector<1x64xf32> to vector<8x64xf32>
      %87 = arith.addf %84, %86 : vector<8x64xf32>
      %cst_54 = arith.constant 0.000000e+00 : f32
      %88 = vector.broadcast %cst_54 : f32 to vector<8x64xf32>
      %89 = arith.maximumf %87, %88 : vector<8x64xf32>
      %90 = arith.truncf %89 : vector<8x64xf32> to vector<8x64xbf16>
      %c0_55 = arith.constant 0 : index
      %c0_56 = arith.constant 0 : index
      %91 = vector.load %arg15[%c0_55, %c0_56] : memref<64x32xbf16, #tpu.memory_space<vmem>>, vector<64x32xbf16>
      %cst_57 = arith.constant dense<0.000000e+00> : vector<8x32xf32>
      %92 = tpu.matmul %90, %91, %cst_57 {dimension_numbers = #tpu.dot_dimension_numbers<[1], [0], [0], [1], [0, 0, 1, 1], [], []>} : vector<8x64xbf16>, vector<64x32xbf16>, vector<8x32xf32> -> vector<8x32xf32>
      %c0_58 = arith.constant 0 : index
      %c0_59 = arith.constant 0 : index
      %93 = vector.load %arg16[%c0_58, %c0_59] : memref<1x32xf32, #tpu.memory_space<vmem>>, vector<1x32xf32>
      %94 = vector.broadcast %93 : vector<1x32xf32> to vector<8x32xf32>
      %95 = arith.addf %92, %94 : vector<8x32xf32>
      %96 = arith.addf %81, %95 : vector<8x32xf32>
      %cst_60 = arith.constant dense<0.000000e+00> : vector<8xf32>
      %97 = vector.multi_reduction <add>, %96, %cst_60 [1] : vector<8x32xf32> to vector<8xf32>
      %98 = vector.shape_cast %97 : vector<8xf32> to vector<8x1xf32>
      %cst_61 = arith.constant 3.200000e+01 : f32
      %99 = vector.broadcast %cst_61 : f32 to vector<8x1xf32>
      %100 = arith.divf %98, %99 : vector<8x1xf32>
      %101 = vector.broadcast %100 : vector<8x1xf32> to vector<8x32xf32>
      %102 = arith.subf %96, %101 : vector<8x32xf32>
      %103 = arith.mulf %102, %102 : vector<8x32xf32>
      %cst_62 = arith.constant dense<0.000000e+00> : vector<8xf32>
      %104 = vector.multi_reduction <add>, %103, %cst_62 [1] : vector<8x32xf32> to vector<8xf32>
      %105 = vector.shape_cast %104 : vector<8xf32> to vector<8x1xf32>
      %cst_63 = arith.constant 3.200000e+01 : f32
      %106 = vector.broadcast %cst_63 : f32 to vector<8x1xf32>
      %107 = arith.divf %105, %106 : vector<8x1xf32>
      %108 = vector.broadcast %100 : vector<8x1xf32> to vector<8x32xf32>
      %109 = arith.subf %96, %108 : vector<8x32xf32>
      %cst_64 = arith.constant 9.99999974E-6 : f32
      %110 = vector.broadcast %cst_64 : f32 to vector<8x1xf32>
      %111 = arith.addf %107, %110 : vector<8x1xf32>
      %112 = math.rsqrt %111 : vector<8x1xf32>
      %113 = vector.broadcast %112 : vector<8x1xf32> to vector<8x32xf32>
      %114 = arith.mulf %109, %113 : vector<8x32xf32>
      %c0_65 = arith.constant 0 : index
      %c0_66 = arith.constant 0 : index
      %115 = vector.load %arg17[%c0_65, %c0_66] : memref<1x32xf32, #tpu.memory_space<vmem>>, vector<1x32xf32>
      %116 = vector.broadcast %115 : vector<1x32xf32> to vector<8x32xf32>
      %117 = arith.mulf %114, %116 : vector<8x32xf32>
      %c0_67 = arith.constant 0 : index
      %c0_68 = arith.constant 0 : index
      %118 = vector.load %arg18[%c0_67, %c0_68] : memref<1x32xf32, #tpu.memory_space<vmem>>, vector<1x32xf32>
      %119 = vector.broadcast %118 : vector<1x32xf32> to vector<8x32xf32>
      %120 = arith.addf %117, %119 : vector<8x32xf32>
      %c0_69 = arith.constant 0 : index
      %c0_70 = arith.constant 0 : index
      %c0_71 = arith.constant 0 : index
      %121 = vector.load %arg19[%c0_69, %c0_70, %c0_71] : memref<1x8x32xf32, #tpu.memory_space<vmem>>, vector<1x8x32xf32>
      %122 = vector.shape_cast %121 : vector<1x8x32xf32> to vector<8x32xf32>
      %123 = vector.shape_cast %120 : vector<8x32xf32> to vector<1x8x32xf32>
      tpu.vector_store %arg19[%c0_69, %c0_70, %c0_71], %123 {strides = array<i32>} : memref<1x8x32xf32, #tpu.memory_space<vmem>>, vector<1x8x32xf32>,
    } else {
    }
    return
  }
  func.func @transform_0(%arg0: i32, %arg1: i32) -> (i32, i32, i32) {
    %c0_i32 = arith.constant 0 : i32
    %c0_i32_0 = arith.constant 0 : i32
    %c0_i32_1 = arith.constant 0 : i32
    return %arg0, %c0_i32, %c0_i32_0 : i32, i32, i32
  }
  func.func @transform_1(%arg0: i32, %arg1: i32) -> (i32, i32, i32) {
    %c0_i32 = arith.constant 0 : i32
    %c0_i32_0 = arith.constant 0 : i32
    %c0_i32_1 = arith.constant 0 : i32
    return %arg1, %c0_i32, %c0_i32_0 : i32, i32, i32
  }
  func.func @transform_2(%arg0: i32, %arg1: i32) -> (i32, i32, i32) {
    %c0_i32 = arith.constant 0 : i32
    %c0_i32_0 = arith.constant 0 : i32
    %c0_i32_1 = arith.constant 0 : i32
    return %arg1, %c0_i32, %c0_i32_0 : i32, i32, i32
  }
  func.func @transform_3(%arg0: i32, %arg1: i32) -> (i32, i32, i32) {
    %c0_i32 = arith.constant 0 : i32
    %c0_i32_0 = arith.constant 0 : i32
    %c0_i32_1 = arith.constant 0 : i32
    return %arg1, %c0_i32, %c0_i32_0 : i32, i32, i32
  }
  func.func @transform_4(%arg0: i32, %arg1: i32) -> (i32, i32, i32) {
    %c0_i32 = arith.constant 0 : i32
    %c0_i32_0 = arith.constant 0 : i32
    %c0_i32_1 = arith.constant 0 : i32
    return %arg1, %c0_i32, %c0_i32_0 : i32, i32, i32
  }
  func.func @transform_5(%arg0: i32, %arg1: i32) -> (i32, i32, i32) {
    %c0_i32 = arith.constant 0 : i32
    %c0_i32_0 = arith.constant 0 : i32
    %c0_i32_1 = arith.constant 0 : i32
    return %arg1, %c0_i32, %c0_i32_0 : i32, i32, i32
  }
  func.func @transform_6(%arg0: i32, %arg1: i32) -> (i32, i32, i32) {
    %c0_i32 = arith.constant 0 : i32
    %c0_i32_0 = arith.constant 0 : i32
    %c0_i32_1 = arith.constant 0 : i32
    return %arg1, %c0_i32, %c0_i32_0 : i32, i32, i32
  }
  func.func @transform_7(%arg0: i32, %arg1: i32) -> (i32, i32, i32) {
    %c0_i32 = arith.constant 0 : i32
    %c0_i32_0 = arith.constant 0 : i32
    %c0_i32_1 = arith.constant 0 : i32
    return %arg1, %c0_i32, %c0_i32_0 : i32, i32, i32
  }
  func.func @transform_8(%arg0: i32, %arg1: i32) -> (i32, i32) {
    %c0_i32 = arith.constant 0 : i32
    %c0_i32_0 = arith.constant 0 : i32
    %c0_i32_1 = arith.constant 0 : i32
    return %c0_i32, %c0_i32_0 : i32, i32
  }
  func.func @transform_9(%arg0: i32, %arg1: i32) -> (i32, i32) {
    %c0_i32 = arith.constant 0 : i32
    %c0_i32_0 = arith.constant 0 : i32
    %c0_i32_1 = arith.constant 0 : i32
    return %c0_i32, %c0_i32_0 : i32, i32
  }
  func.func @transform_10(%arg0: i32, %arg1: i32) -> (i32, i32) {
    %c0_i32 = arith.constant 0 : i32
    %c0_i32_0 = arith.constant 0 : i32
    %c0_i32_1 = arith.constant 0 : i32
    return %c0_i32, %c0_i32_0 : i32, i32
  }
  func.func @transform_11(%arg0: i32, %arg1: i32) -> (i32, i32) {
    %c0_i32 = arith.constant 0 : i32
    %c0_i32_0 = arith.constant 0 : i32
    %c0_i32_1 = arith.constant 0 : i32
    return %c0_i32, %c0_i32_0 : i32, i32
  }
  func.func @transform_12(%arg0: i32, %arg1: i32) -> (i32, i32) {
    %c0_i32 = arith.constant 0 : i32
    %c0_i32_0 = arith.constant 0 : i32
    %c0_i32_1 = arith.constant 0 : i32
    return %c0_i32, %c0_i32_0 : i32, i32
  }
  func.func @transform_13(%arg0: i32, %arg1: i32) -> (i32, i32) {
    %c0_i32 = arith.constant 0 : i32
    %c0_i32_0 = arith.constant 0 : i32
    %c0_i32_1 = arith.constant 0 : i32
    return %c0_i32, %c0_i32_0 : i32, i32
  }
  func.func @transform_14(%arg0: i32, %arg1: i32) -> (i32, i32) {
    %c0_i32 = arith.constant 0 : i32
    %c0_i32_0 = arith.constant 0 : i32
    %c0_i32_1 = arith.constant 0 : i32
    return %c0_i32, %c0_i32_0 : i32, i32
  }
  func.func @transform_15(%arg0: i32, %arg1: i32) -> (i32, i32) {
    %c0_i32 = arith.constant 0 : i32
    %c0_i32_0 = arith.constant 0 : i32
    %c0_i32_1 = arith.constant 0 : i32
    return %c0_i32, %c0_i32_0 : i32, i32
  }
  func.func @transform_16(%arg0: i32, %arg1: i32) -> (i32, i32) {
    %c0_i32 = arith.constant 0 : i32
    %c0_i32_0 = arith.constant 0 : i32
    %c0_i32_1 = arith.constant 0 : i32
    return %c0_i32, %c0_i32_0 : i32, i32
  }
  func.func @transform_17(%arg0: i32, %arg1: i32) -> (i32, i32, i32) {
    %c0_i32 = arith.constant 0 : i32
    %c0_i32_0 = arith.constant 0 : i32
    %c0_i32_1 = arith.constant 0 : i32
    return %arg0, %c0_i32, %c0_i32_0 : i32, i32, i32
  }
}

</mosaic_0001>

<bundles_post_ra>
// kernel: tpu_custom_call.1
= control target key start
LH: loop header
LB: loop body
LE: loop exit
PB: predicated region body
PF: predicated region fallthrough
CT: control target
= control target key end

     0   :  { %s2103_s0 = inlined_call_operand.vmem [shape: f32[2,8,32], index: 0, kind: input, shape index: {}]   ;;  %s2104_s1 = inlined_call_operand.vmem [shape: bf16[4,32,8], index: 1, kind: input, shape index: {}]   ;;  %s2105_s2 = inlined_call_operand.vmem [shape: bf16[4,32,8], index: 2, kind: input, shape index: {}]   ;;  %s2106_s3 = inlined_call_operand.vmem [shape: bf16[4,32,8], index: 3, kind: input, shape index: {}]   ;;  %s2107_s4 = inlined_call_operand.vmem [shape: f32[4,1,8], index: 4, kind: input, shape index: {}]   ;;  %s2108_s5 = inlined_call_operand.vmem [shape: f32[4,1,8], index: 5, kind: input, shape index: {}]   ;;  %s2109_s6 = inlined_call_operand.vmem [shape: f32[4,1,8], index: 6, kind: input, shape index: {}]   ;;  %s2110_s7 = inlined_call_operand.vmem [shape: bf16[4,8,32], index: 7, kind: input, shape index: {}]   ;;  %s2111_s8 = inlined_call_operand.vmem [shape: f32[1,32], index: 8, kind: input, shape index: {}]   ;;  %s2112_s9 = inlined_call_operand.vmem [shape: f32[1,32], index: 9, kind: input, shape index: {}]   ;;  %s2113_s10 = inlined_call_operand.vmem [shape: f32[1,32], index: 10, kind: input, shape index: {}]   ;;  %s2114_s11 = inlined_call_operand.vmem [shape: bf16[32,64], index: 11, kind: input, shape index: {}]   ;;  %s2115_s12 = inlined_call_operand.vmem [shape: f32[1,64], index: 12, kind: input, shape index: {}]   ;;  %s2116_s13 = inlined_call_operand.vmem [shape: bf16[64,32], index: 13, kind: input, shape index: {}]   ;;  %s2117_s14 = inlined_call_operand.vmem [shape: f32[1,32], index: 14, kind: input, shape index: {}]   ;;  %s2118_s15 = inlined_call_operand.vmem [shape: f32[1,32], index: 15, kind: input, shape index: {}]   ;;  %s2119_s16 = inlined_call_operand.vmem [shape: f32[1,32], index: 16, kind: input, shape index: {}]   ;;  %s2120_s17 = inlined_call_operand.hbm [shape: f32[2,8,32], index: 17, kind: output, shape index: {}]  }
   0x1   :  { %2134 = sst [smem:[#allocation17_spill]] %s2103_s0 }
   0x2   :  { %2135 = sst [smem:[#allocation18_spill]] %s2104_s1 }
   0x3   :  { %2136 = sst [smem:[#allocation19_spill]] %s2105_s2 }
   0x4   :  { %2137 = sst [smem:[#allocation20_spill]] %s2119_s16 }
   0x5   :  { %2138 = sst [smem:[#allocation21_spill]] %s2120_s17 }
   0x6   :  { %22 = vsyncpa [#allocation4], 0 }
   0x7   :  { %24 = vsyncpa [#allocation4 + $0x1], 0  ;;  %s1848_s24 = smov 0   ;;  %s1850_s25 = smov 0  }
   0x8   :  { %s1852_s26 = smov 0   ;;  %s1854_s27 = smov 0  }
   0x9   :  { %s1856_s28 = smov 0   ;;  %s1858_s29 = smov 0  }
   0xa   :  { %s1860_s0 = smov 0   ;;  %s1862_s30 = smov 0  }
   0xb LB: > { %2139 = sst [smem:[#allocation6_spill]] %s1722_s24  ;;  %s1422_s18 = sadd.s32 4294967295, %s1750_s30   ;;  %s1750_s30 = sphi %s1862_s30, %s30_s30   ;;  %s1746_s0 = sphi %s1860_s0, %s2170_s0   ;;  %s1742_s29 = sphi %s1858_s29, %s2169_s29   ;;  %s1738_s28 = sphi %s1856_s28, %s2168_s28   ;;  %s1734_s27 = sphi %s1854_s27, %s2167_s27   ;;  %s1730_s26 = sphi %s1852_s26, %s2166_s26   ;;  %s1726_s25 = sphi %s1850_s25, %s2165_s25   ;;  %s1722_s24 = sphi %s1848_s24, %s2164_s24  }
   0xc   : > { %2140 = sst [smem:[#allocation7_spill]] %s1726_s25  ;;  %s1423_s19 = sadd.s32 4294967294, %s1750_s30  }
   0xd   : > { %2141 = sst [smem:[#allocation8_spill]] %s1730_s26  ;;  %s39_s1 = sadd.s32 1, %s1742_s29 }
   0xe   : > { %2142 = sst [smem:[#allocation9_spill]] %s1742_s29  ;;  %p40_p0 = scmp.ge.s32.totalorder %s39_s1, 4 }
   0xf   : > { %2143 = sst [smem:[#allocation10_spill]] %s1746_s0  ;;  %s42_s20 = sadd.s32 1, %s1746_s0 }
  0x10   : > { %2144 = sst [smem:[#allocation11_spill]] %s1750_s30  ;;  %p456_p1 = scmp.ne.s32.totalorder %s1730_s26, %s1726_s25 }
  0x11   : > { %p457_p2 = scmp.eq.s32.totalorder %s1422_s18, 7  ;;  %s2172_s1 = smov (%p40_p0, %s39_s1), 0 }
  0x12   : > { %2145 = sst [smem:[#allocation12_spill]] %s2172_s1  ;;  %s2174_s20 = smov (!%p40_p0, %s42_s20), %s1746_s0 }
  0x13   : > { %p1897_p3 = por %p457_p2, %p456_p1  ;;  %p462_p4 = scmp.ne.s32.totalorder %s1726_s25, %s1722_s24 }
  0x14   : > { %p44_p5 = scmp.ge.s32.totalorder %s2174_s20, 2  ;;  %p463_p6 = scmp.eq.s32.totalorder %s1423_s19, 7 }
  0x15   : > { %s2146_s21 = scalar_select %p1897_p3, 1, 0 }
  0x16   : > { %p1426_p7 = scmp.ge.s32.totalorder %s1750_s30, 1  ;;  %p564_p8 = scmp.lt.s32.totalorder %s1750_s30, 9 }
  0x17   : > { %2147 = sst [smem:[#allocation13_spill]] %s2146_s21  ;;  %s2176_s20 = smov (%p44_p5, %s2174_s20), 0 }
  0x18   : > { %2148 = sst [smem:[#allocation14_spill]] %s2176_s20  ;;  %p1907_p9 = por %p463_p6, %p462_p4 }
  0x19   : > { %p565_p10 = pnand %p1426_p7, %p564_p8  ;;  %s443_s23 = ssub.s32 %s1746_s0, %s2176_s20 }
  0x1a   : > { %s2149_s22 = scalar_select %p1907_p9, 1, 0 }
  0x1b   : > { %s446_s18 = sadd.s32 1, %s1730_s26  ;;  %p444_p11 = scmp.eq.s32.totalorder %s443_s23, 0  ;;  %v1752_v0 = vmov (!%p565_p10), 0.0   ;;  %vm1753_vm0 = vmmov (!%p565_p10), 0   ;;  %vm701_vm1 = vcmask (!%p565_p10), 261120   ;;  %vm873_vm2 = vcmask (!%p565_p10), 64512  }
  0x1c   : > { %2150 = sst [smem:[#allocation15_spill]] %s2149_s22  ;;  %568 = sbr.rel (%p565_p10) target bundleno = 2335 (0x91f), region = 88  ;;  %1506 = vmatprep.subr.bf16.mxu1 (!%p565_p10), %v1752_v0  ;;  %1498 = vmatprep.subr.bf16.mxu0 (!%p565_p10), %v1752_v0  ;;  %vm936_vm3 = vcmask (!%p565_p10), 1043456  }
  0x1d   : > { %s1915_s1 = scalar_select %p444_p11, %s1730_s26, %s446_s18  }
  0x1e   : > { %p647_p12 = scmp.lt.s32.totalorder (!%p565_p10), %s1734_s27, 3  ;;  %s2124_s19 = sand.u32 (!%p565_p10), 1, %s1726_s25   ;;  %1510 = vmatprep.mubr.msk.bf16.mxu1 (!%p565_p10), %vm1753_vm0, %v1752_v0  ;;  %1502 = vmatprep.mubr.msk.bf16.mxu0 (!%p565_p10), %vm1753_vm0, %v1752_v0 }
  0x1f   : > { %2151 = sst [smem:[#allocation16_spill]] %s1915_s1  ;;  %s1922_s29 = sshll.u32 (!%p565_p10), %s2124_s19, 3 }
  0x20   : > { %p643_p13 = scmp.lt.s32.totalorder (!%p565_p10), %s1738_s28, 1  ;;  %s2152_s2 = sld [smem:[#allocation19_spill]] (!%p565_p10) }
  0x21   : > { %s2153_s22 = sld [smem:[#allocation18_spill]] (!%p565_p10)  ;;  %p1451_p0 = scmp.ne.s32.totalorder (!%p565_p10), %s1734_s27, 0 }
  0x23   : > { %s1926_s23 = scalar_select %p647_p12, %s1734_s27, 3 }
  0x24   : > { %s644_s30 = scalar_select %p643_p13, %s1738_s28, 1 }
  0x25   : > { %s1472_s18 = sshll.u32 %s1926_s23, 4  ;;  %s667_s17 = scalar_lea.vmem %s2108_s5, %s1926_s23  ;;  %v1754_v57 = vmov (!%p1451_p0), 0.0  }
  0x26   : > { %s656_s1 = scalar_lea.vmem %s2152_s2, %s1472_s18  ;;  %s1944_s25 = scalar_lea.vmem %s2106_s3, %s1472_s18  ;;  %v1440_v7 = vld [vmem:[%s667_s17] ss:$0 sm:$0xff]  ;;  %1032 = vst.msk [vmem:[#allocation2] sm:$0xff] (!%p1451_p0), %vm701_vm1, %v1754_v57 }
  0x27   : > { %v1636_v1 = vld [vmem:[%s656_s1] sm:$0xff]   ;;  %s651_s24 = scalar_lea.vmem %s2153_s22, %s1472_s18  ;;  %v1637_v2 = vld [vmem:[%s656_s1 + $0x8] sm:$0xff]   ;;  %s1428_s16 = sshll.u32 %s644_s30, 3 }
  0x28   : > { %1507 = vmatpush3.bf16.msra.mxu1 %v1636_v1  ;;  %v1638_v3 = vld [vmem:[%s651_s24] sm:$0xff]   ;;  %v1639_v4 = vld [vmem:[%s651_s24 + $0x8] sm:$0xff]   ;;  %s2154_s2 = sld [smem:[#allocation17_spill]]  ;;  %s664_s1 = scalar_lea.vmem %s2107_s4, %s1926_s23 }
  0x29   : > { %1508 = vmatprep.subr.bf16.mxu1 %v1752_v0  ;;  %1499 = vmatpush3.bf16.msra.mxu0 %v1638_v3  ;;  %v1436_v12 = vld [vmem:[%s664_s1] ss:$0 sm:$0xff]  ;;  %v1641_v23 = vld [vmem:[%s1944_s25 + $0x8] sm:$0xff]   ;;  %s670_s22 = scalar_lea.vmem %s2109_s6, %s1926_s23  ;;  %s1435_s19 = sshll.u32 %s1926_s23, 2 }
  0x2a   : > { %1500 = vmatprep.subr.bf16.mxu0 %v1752_v0  ;;  %v1640_v22 = vld [vmem:[%s1944_s25] sm:$0xff]   ;;  %s674_s20 = scalar_lea.vmem %s2110_s7, %s1435_s19  ;;  %s642_s23 = scalar_lea.vmem [#allocation3], %s1922_s29 }
  0x2b   : > { %v1444_v37 = vld [vmem:[%s670_s22] ss:$0 sm:$0xff] }
  0x2c   : > { %1509 = vmatpush3.bf16.msra.mxu1 %v1637_v2  ;;  %v981_v42 = vld [vmem:[%s674_s20] sm:$0xf] }
  0x2d   : > { %1522 = vmatprep.subr.bf16.mxu1 %v1752_v0  ;;  %1501 = vmatpush3.bf16.msra.mxu0 %v1639_v4  ;;  %v986_v43 = vsel %vm936_vm3, %v981_v42, 0 }
  0x2e   : > { %s646_s26 = scalar_lea.vmem %s2154_s2, %s1428_s16  ;;  %1514 = vmatprep.subr.bf16.mxu0 %v1752_v0 }
  0x2f   : > { %v1950_v5 = vld [vmem:[%s646_s26] sm:$0xff] }
  0x30   : > { %v677_v6 = vpack.c.bf16 %v1950_v5, %v1950_v5 }
  0x32   : > { %1511 = vmatmul.mubr.msk.bf16.vlgmr.msra.gmra.mrb[0].mxu1 %vm701_vm1, %v677_v6  ;;  %1503 = vmatmul.mubr.msk.bf16.vlgmr.msra.gmra.mrb[0].mxu0 %vm701_vm1, %v677_v6 }
  0x33   : > { %1524 = vmatprep.mubr.msk.bf16.mxu1 %vm1753_vm0, %v1752_v0  ;;  %1518 = vmatprep.mubr.msk.bf16.mxu0 %vm1753_vm0, %v1752_v0 }
  0x34   : > { %1515 = vmatpush3.bf16.msra.mxu0 %v1640_v22 }
  0x35   : > { %1516 = vmatprep.subr.bf16.mxu0 %v1752_v0 }
  0x38   : > { %1517 = vmatpush3.bf16.msra.mxu0 %v1641_v23 }
  0x39   : > { %1528 = vmatprep.subr.bf16.mxu0 %v1752_v0 }
  0x3b   : > { %1519 = vmatmul.mubr.msk.bf16.vlgmr.msra.gmra.mrb[4].mxu0 %vm701_vm1, %v677_v6 }
  0x3c   : > { %1530 = vmatprep.mubr.msk.bf16.mxu0 %vm1753_vm0, %v1752_v0 }
 0x105   : > { %v802_v8 = vpop.f32.mrb[0].mxu1  ;;  %v739_v13 = vpop.f32.mrb[0].mxu0 }
 0x106   : > { %v803_v9 = vadd.f32 %v1440_v7, %v802_v8  ;;  %v1512_v10 = vpop.f32.mrb[1].mxu1  ;;  %v1504_v16 = vpop.f32.mrb[1].mxu0  ;;  %v740_v19 = vadd.f32 %v1436_v12, %v739_v13 }
 0x107   : > { %v805_v11 = vpop.f32.mrb[2].mxu1  ;;  %v742_v17 = vpop.f32.mrb[2].mxu0 }
 0x108   : > { %v872_v14 = vpack.c.bf16 %v803_v9, %v803_v9  ;;  %v1513_v15 = vpop.f32.mrb[3].mxu1  ;;  %v1505_v20 = vpop.f32.mrb[3].mxu0  ;;  %v871_v21 = vpack.c.bf16 %v740_v19, %v740_v19 }
 0x10a   : > { %v878_v18 = vsel %vm873_vm2, %v872_v14, 0 }
 0x10b   : > { %1523 = vmatpush3.bf16.xpose.msra.mxu1 %v878_v18 }
 0x10c   : > { %1534 = vmatprep.subr.bf16.mxu1 %v1752_v0 }
 0x10e   : > { %v865_v34 = vpop.f32.mrb[4].mxu0 }
 0x10f   : > { %v1520_v35 = vpop.f32.mrb[5].mxu0  ;;  %v866_v39 = vadd.f32 %v1444_v37, %v865_v34 }
 0x110   : > { %v868_v36 = vpop.f32.mrb[6].mxu0 }
 0x111   : > { %v1521_v38 = vpop.f32.mrb[7].mxu0  ;;  %v932_v40 = vpack.c.bf16 %v866_v39, %v866_v39 }
 0x112   : > { %1525 = vmatmul.mubr.msk.bf16.vlgmr.msra.gmra.mrb[4].mxu1 %vm873_vm2, %v871_v21 }
 0x113   : > { %1536 = vmatprep.mubr.msk.bf16.mxu1 %vm1753_vm0, %v1752_v0  ;;  %v938_v41 = vsel %vm936_vm3, %v932_v40, 0  ;;  %1535 = vmatpush3.bf16.msra.mxu1 %v986_v43 }
 0x114   : > { %1529 = vmatpush3.bf16.msra.mxu0 %v938_v41 }
 0x1e5   : > { %v914_v24 = vpop.f32.mrb[4].mxu1 }
 0x1e6   : > { %v1526_v25 = vpop.f32.mrb[5].mxu1  ;;  %v920_v26 = vsel %vm873_vm2, %v914_v24, -inf }
 0x1e7   : > { %921 = vmax.xlane.f32.xlu0 %v920_v26  ;;  %v917_v27 = vpop.f32.mrb[6].mxu1 }
 0x1e8   : > { %v1527_v28 = vpop.f32.mrb[7].mxu1 }
 0x274   : > { %v922_v29 = vpop.xlane.xlu0 %921 }
 0x275   : > { %v923_v30 = vsub.f32 %v914_v24, %v922_v29 }
 0x277   : > { %v924_v31 = vmul.f32 1.442695, %v923_v30 }
 0x279   : > { %1642 = vpow2.f32 %v924_v31 }
 0x283   : > { %v1643_v32 = vpop.eup %1642 }
 0x284   : > { %v926_v33 = vsel %vm873_vm2, %v1643_v32, 0.0 }
 0x285   : > { %927 = vadd.xlane.f32.xlu0 %v926_v33 }
 0x312   : > { %v928_v44 = vpop.xlane.xlu0 %927 }
 0x313   : > { %1644 = vrcp.f32 %v928_v44 }
 0x31d   : > { %v1645_v45 = vpop.eup %1644 }
 0x31e   : > { %v930_v46 = vmul.f32 %v1645_v45, %v1643_v32 }
 0x320   : > { %v931_v47 = vpack.c.bf16 %v930_v46, %v930_v46 }
 0x322   : > { %1531 = vmatmul.mubr.msk.bf16.vlgmr.msra.gmra.mrb[8].mxu0 %vm873_vm2, %v931_v47 }
 0x3f5   : > { %v974_v48 = vpop.f32.mrb[8].mxu0 }
 0x3f6   : > { %v980_v49 = vpack.c.bf16 %v974_v48, %v974_v48  ;;  %v1532_v50 = vpop.f32.mrb[9].mxu0 }
 0x3f7   : > { %v977_v51 = vpop.f32.mrb[10].mxu0 }
 0x3f8   : > { %v1533_v52 = vpop.f32.mrb[11].mxu0  ;;  %1537 = vmatmul.mubr.msk.bf16.vlgmr.msra.gmra.mrb[8].mxu1 %vm873_vm2, %v980_v49 }
 0x4c8   : > { %1031 = sbr.rel (%p1451_p0) target bundleno = 1231 (0x4cf), region = 92 }
 0x4cb   : > { %v1022_v53 = vpop.f32.mrb[8].mxu1 }
 0x4cc   : > { %v1538_v54 = vpop.f32.mrb[9].mxu1 }
 0x4cd   : > { %v1025_v55 = vpop.f32.mrb[10].mxu1 }
 0x4ce   : > { %v1539_v56 = vpop.f32.mrb[11].mxu1 }
 0x4cf PF: > { %v1033_v58 = vld [vmem:[#allocation2] sm:$0xff]  ;;  %p1452_p1 = scmp.ne.s32.totalorder %s1734_s27, 3 }
 0x4d0   : > { %v1034_v59 = vadd.f32 %v1033_v58, %v1022_v53  ;;  %v1453_v61 = vld [vmem:[%s2111_s8] ss:$0 sm:$0xff] (!%p1452_p1)  ;;  %v1755_v8 = vmov (!%p1452_p1), 0.0   ;;  %vm1756_vm4 = vmmov (!%p1452_p1), 0   ;;  %v1649_v10 = vld [vmem:[%s2116_s13 + $0x8] sm:$0xff] (!%p1452_p1)   ;;  %v1650_v21 = vld [vmem:[%s2116_s13 + $0x10] sm:$0xff] (!%p1452_p1)  }
 0x4d1   : > { %1039 = sbr.rel (%p1452_p1) target bundleno = 2309 (0x905), region = 96  ;;  %v1646_v7 = vld [vmem:[%s2114_s11] sm:$0xff] (!%p1452_p1)   ;;  %1540 = vmatprep.subr.bf16.mxu0 (!%p1452_p1), %v1755_v8  ;;  %1544 = vmatprep.mubr.msk.bf16.mxu0 (!%p1452_p1), %vm1756_vm4, %v1755_v8  ;;  %v1651_v22 = vld [vmem:[%s2116_s13 + $0x18] sm:$0xff] (!%p1452_p1)   ;;  %vm1188_vm5 = vcmask (!%p1452_p1), 523264   ;;  %s2155_s19 = sld [smem:[#allocation20_spill]] (!%p1452_p1) }
 0x4d2   : > { %1035 = vst.msk [vmem:[#allocation2] sm:$0xff] %vm701_vm1, %v1034_v59  ;;  %1541 = vmatpush3.bf16.msra.mxu0 (!%p1452_p1), %v1646_v7  ;;  %1548 = vmatprep.subr.bf16.mxu1 (!%p1452_p1), %v1755_v8  ;;  %v1648_v9 = vld [vmem:[%s2116_s13] sm:$0xff] (!%p1452_p1)  }
 0x4d3   : > { %1542 = vmatprep.subr.bf16.mxu0 (!%p1452_p1), %v1755_v8  ;;  %1556 = vmatprep.mubr.msk.bf16.mxu1 (!%p1452_p1), %vm1756_vm4, %v1755_v8  ;;  %v1454_v15 = vld [vmem:[%s2112_s9] ss:$0 sm:$0xff] (!%p1452_p1) }
 0x4d4   : > { %1549 = vmatpush3.bf16.msra.mxu1 (!%p1452_p1), %v1648_v9  ;;  %v1455_v17 = vld [vmem:[%s2113_s10] ss:$0 sm:$0xff] (!%p1452_p1) }
 0x4d5   : > { %1550 = vmatprep.subr.bf16.mxu1 (!%p1452_p1), %v1755_v8  ;;  %v1456_v23 = vld [vmem:[%s2115_s12] ss:$0 sm:$0xff] (!%p1452_p1) }
 0x4d6   : > { %v1460_v31 = vld [vmem:[%s2117_s14] ss:$0 sm:$0xff] (!%p1452_p1) }
 0x4d7   : > { %v1466_v48 = vld [vmem:[%s2118_s15] ss:$0 sm:$0xff] (!%p1452_p1) }
 0x4d8   : > { %1551 = vmatpush3.bf16.msra.mxu1 %v1649_v10  ;;  %v1467_v50 = vld [vmem:[%s2155_s19] ss:$0 sm:$0xff] }
 0x4d9   : > { %v1040_v60 = vld [vmem:[#allocation2] sm:$0xff]  ;;  %1552 = vmatprep.subr.bf16.mxu1 %v1755_v8 }
 0x4da   : > { %v1048_v62 = vadd.f32 %v1453_v61, %v1040_v60 }
 0x4dc   : > { %v1049_v63 = vadd.f32 %v1048_v62, %v1950_v5  ;;  %v1647_v5 = vld [vmem:[%s2114_s11 + $0x8] sm:$0xff]   ;;  %1553 = vmatpush3.bf16.msra.mxu1 %v1650_v21 }
 0x4dd   : > { %1543 = vmatpush3.bf16.msra.mxu0 %v1647_v5  ;;  %1554 = vmatprep.subr.bf16.mxu1 %v1755_v8 }
 0x4de   : > { %v1050_v0 = vsel %vm701_vm1, %v1049_v63, 0.0 }
 0x4df   : > { %1051 = vadd.xlane.f32.xlu0 %v1050_v0 }
 0x4e0   : > { %1555 = vmatpush3.bf16.msra.mxu1 %v1651_v22 }
 0x56c   : > { %v1052_v1 = vpop.xlane.xlu0 %1051 }
 0x56d   : > { %v1054_v2 = vmul.f32 0.03125, %v1052_v1 }
 0x56f   : > { %v1055_v3 = vsub.f32 %v1049_v63, %v1054_v2 }
 0x571   : > { %v1056_v4 = vmul.f32 %v1055_v3, %v1055_v3 }
 0x573   : > { %v1057_v6 = vsel %vm701_vm1, %v1056_v4, 0.0 }
 0x574   : > { %1058 = vadd.xlane.f32.xlu0 %v1057_v6 }
 0x601   : > { %v1059_v11 = vpop.xlane.xlu0 %1058 }
 0x602   : > { %v1060_v12 = vmul.f32 0.03125, %v1059_v11 }
 0x604   : > { %v1061_v13 = vadd.f32 1e-05, %v1060_v12 }
 0x606   : > { %1652 = vrsqrt.f32 %v1061_v13 }
 0x610   : > { %v1653_v14 = vpop.eup %1652 }
 0x611   : > { %v1063_v16 = vmul.f32 %v1653_v14, %v1055_v3 }
 0x613   : > { %v1071_v18 = vmul.f32 %v1454_v15, %v1063_v16 }
 0x615   : > { %v1079_v19 = vadd.f32 %v1455_v17, %v1071_v18 }
 0x617   : > { %v1080_v20 = vpack.c.bf16 %v1079_v19, %v1079_v19 }
 0x619   : > { %1545 = vmatmul.mubr.msk.bf16.vlgmr.msra.gmra.mrb[0].mxu0 %vm701_vm1, %v1080_v20 }
 0x6ec   : > { %v1141_v24 = vpop.f32.mrb[0].mxu0 }
 0x6ed   : > { %v1142_v25 = vadd.f32 %v1456_v23, %v1141_v24  ;;  %v1546_v26 = vpop.f32.mrb[1].mxu0 }
 0x6ee   : > { %v1144_v27 = vpop.f32.mrb[2].mxu0 }
 0x6ef   : > { %v1147_v28 = vmax.f32 %v1142_v25, 0.0  ;;  %v1547_v29 = vpop.f32.mrb[3].mxu0 }
 0x6f1   : > { %v1148_v30 = vpack.c.bf16 %v1147_v28, %v1147_v28 }
 0x6f3   : > { %1557 = vmatmul.mubr.msk.bf16.vlgmr.msra.gmra.mrb[0].mxu1 %vm1188_vm5, %v1148_v30 }
 0x7c6   : > { %v1226_v32 = vpop.f32.mrb[0].mxu1 }
 0x7c7   : > { %v1227_v33 = vadd.f32 %v1460_v31, %v1226_v32  ;;  %v1558_v34 = vpop.f32.mrb[1].mxu1 }
 0x7c8   : > { %v1229_v35 = vpop.f32.mrb[2].mxu1 }
 0x7c9   : > { %v1559_v36 = vpop.f32.mrb[3].mxu1  ;;  %v1232_v37 = vadd.f32 %v1227_v33, %v1079_v19 }
 0x7cb   : > { %v1233_v38 = vsel %vm701_vm1, %v1232_v37, 0.0 }
 0x7cc   : > { %1234 = vadd.xlane.f32.xlu1 %v1233_v38 }
 0x859   : > { %v1235_v39 = vpop.xlane.xlu1 %1234 }
 0x85a   : > { %v1236_v40 = vmul.f32 0.03125, %v1235_v39 }
 0x85c   : > { %v1237_v41 = vsub.f32 %v1232_v37, %v1236_v40 }
 0x85e   : > { %v1238_v42 = vmul.f32 %v1237_v41, %v1237_v41 }
 0x860   : > { %v1239_v43 = vsel %vm701_vm1, %v1238_v42, 0.0 }
 0x861   : > { %1240 = vadd.xlane.f32.xlu1 %v1239_v43 }
 0x8ee   : > { %v1241_v44 = vpop.xlane.xlu1 %1240 }
 0x8ef   : > { %v1242_v45 = vmul.f32 0.03125, %v1241_v44 }
 0x8f1   : > { %v1243_v46 = vadd.f32 1e-05, %v1242_v45 }
 0x8f3   : > { %1654 = vrsqrt.f32 %v1243_v46 }
 0x8fd   : > { %v1655_v47 = vpop.eup %1654 }
 0x8fe   : > { %v1245_v49 = vmul.f32 %v1655_v47, %v1237_v41 }
 0x900   : > { %v1253_v51 = vmul.f32 %v1466_v48, %v1245_v49 }
 0x902   : > { %v1261_v52 = vadd.f32 %v1467_v50, %v1253_v51 }
 0x904   : > { %1262 = vst.msk [vmem:[%s642_s23] sm:$0xff] %vm701_vm1, %v1261_v52 }
 0x905 PF: > { %s2156_s18 = sld [smem:[#allocation7_spill]]  ;;  %s1469_s20 = sshll.u32 %s1738_s28, 7 }
 0x906   : > { %s2158_s27 = sld [smem:[#allocation21_spill]]  ;;  %s1277_s24 = sshll.u32 %s642_s23, 4  ;;  %s1278_s24 = int_to_ptr.vmem [resolvable:$true] %s1277_s24 }
 0x907   : > { %s1656_s25 = scalar_lea.vmem %s1278_s24, 128  ;;  %s1757_s21 = smov [#allocation3]  }
 0x908   : > { %p1657_p2 = scmp.ne.s32.totalorder %s1278_s24, %s1656_s25  ;;  %s1660_s22 = sshll.u32 %s1757_s21, 4  ;;  %s1661_s22 = int_to_ptr.vmem [resolvable:$false] %s1660_s22 }
 0x909   : > { %s1662_s19 = scalar_lea.vmem %s1661_s22, 256  ;;  %p1663_p6 = scmp.lt.s32.totalorder %s1278_s24, %s1661_s22 }
 0x90a   : > { %p1658_p4 = pnand %p1657_p2, %p1897_p3  ;;  %p1664_p7 = scmp.lt.s32.totalorder %s1662_s19, %s1656_s25 }
 0x90b   : > { %s2160_s30 = sand.u32 1, %s2156_s18  }
 0x90c   : > { %s2159_s16 = smov %s2158_s27  ;;  %s2052_s17 = scalar_lea.hbm %s2158_s27, %s1469_s20 }
 0x90d   : > { %s1264_s1 = scalar_lea.sflag [#allocation4], %s2160_s30  ;;  %p1659_p5 = pneg %p1658_p4 }
 0x90e   : > { %p1665_p8 = por %p1664_p7, %p1663_p6 }
 0x910   : > { %p1666_p10 = pnand %p1665_p8, %p1659_p5 }
 0x912   : > { %1669 = shalt.err (!%p1666_p10)
}
 0x913   : > { %s1670_s28 = scalar_lea.hbm %s2052_s17, 128  ;;  %s1674_s18 = scalar_lea.hbm %s2159_s16, 256 }
 0x914   : > { %p1671_p11 = scmp.ne.s32.totalorder %s2052_s17, %s1670_s28  ;;  %p1675_p0 = scmp.lt.u32.totalorder %s2052_s17, %s2159_s16 }
 0x915   : > { %p1676_p1 = scmp.lt.u32.totalorder %s1674_s18, %s1670_s28  ;;  %p1678_p4 = scmp.lt.u32.totalorder %s1670_s28, %s2052_s17 }
 0x916   : > { %p1672_p12 = pnand %p1671_p11, %p1897_p3 }
 0x917   : > { %p1677_p2 = por %p1676_p1, %p1675_p0 }
 0x918   : > { %p1673_p13 = pneg %p1672_p12 }
 0x919   : > { %p1679_p5 = por %p1678_p4, %p1677_p2 }
 0x91b   : > { %p1680_p6 = pnand %p1679_p5, %p1673_p13 }
 0x91d   : > { %1683 = shalt.err (!%p1680_p6)
}
 0x91e   : > { %1560 = dma.vmem_to_hbm [thread:$0]  (%p1897_p3), %s1278_s24, 128, %s2052_s17, %s1264_s1  }
 0x91f PF: > { %s2161_s2 = sld [smem:[#allocation11_spill]]  ;;  %s2162_s27 = sld [smem:[#allocation6_spill]] }
 0x925   : > { %p1566_p7 = scmp.ge.s32.totalorder %s2161_s2, 2  ;;  %s1289_s25 = sand.u32 1, %s2162_s27  }
 0x926   : > { %s1290_s21 = scalar_lea.sflag [#allocation4], %s1289_s25 }
 0x927   : > { %p1563_p8 = pnand %p1566_p7, %p1907_p9 }
 0x929   : > { %1717 = dma.done.wait (!%p1563_p8), %s1290_s21, 128  }
 0x92a   : > { %1719 = vsyncadd (!%p1563_p8), %s1290_s21, 4294967168  ;;  %s30_s30 = sadd.s32 1, %s2161_s2   ;;  %s2164_s24 = sld [smem:[#allocation7_spill]] }
 0x92b   : > { %p27_p10 = scmp.ge.s32.totalorder %s30_s30, 10   ;;  %s2165_s25 = sld [smem:[#allocation8_spill]] }
 0x92c   : > { %s2166_s26 = sld [smem:[#allocation16_spill]]  ;;  %s2167_s27 = sld [smem:[#allocation9_spill]] }
 0x92d   : > { %s2168_s28 = sld [smem:[#allocation10_spill]]  ;;  %s2169_s29 = sld [smem:[#allocation12_spill]] }
 0x92e   : > { %s2170_s0 = sld [smem:[#allocation14_spill]]  ;;  %29 = sbr.rel (!%p27_p10) target bundleno = 11 (0xb), region = 152 }
 0x935   :  { %1295 = vsyncpa [#allocation4], 1 }
 0x936   :  { %1297 = vsyncpa [#allocation4 + $0x1], 1 }

</bundles_post_ra>
